<compile_context>
chip_gen: v7x
topology: tpu7x:2x2x1
jax: 0.10.0
libtpu: 0.0.40
codegen_flags: <defaults>
</compile_context>

<pallas_src>
import functools
import math

import jax
import jax.numpy as jnp
from jax.experimental import pallas as pl
from jax.experimental.pallas import tpu as pltpu


# ---------------------------------------------------------------------------
# Kernels
# ---------------------------------------------------------------------------
def _pe_add_3d_kernel(x_ref, pe_ref, o_ref):
    # x_ref/o_ref: (ts, B, D), pe_ref: (ts, 1, D) -> implicit batch broadcast.
    o_ref[...] = x_ref[...] + pe_ref[...]


def _pe_add_flat_kernel(x_ref, pe_ref, o_ref, *, batch: int):
    # x_ref/o_ref: (ts, B*D), pe_ref: (ts, D).
    pe_row = pe_ref[...]
    if batch > 1:
        # Single tile op replicating pe along the lane axis to match the
        # row-major (b, d) -> b*D + d flatten of x.
        pe_row = jnp.tile(pe_row, (1, batch))
    o_ref[...] = x_ref[...] + pe_row


# ---------------------------------------------------------------------------
# PE table (matches the PyTorch buffer exactly, shape (max_len, 1, d_model))
# ---------------------------------------------------------------------------
def make_pe_table(d_model: int, max_len: int = 5000, dtype=jnp.float32):
    position = jnp.arange(0, max_len, dtype=jnp.float32)[:, None]            # (L, 1)
    div_term = jnp.exp(
        -jnp.arange(0, d_model, 2, dtype=jnp.float32) * (math.log(10000.0) / d_model)
    )                                                                         # (ceil(D/2),)
    ang = position * div_term                                                 # (L, ceil(D/2))
    pe = jnp.zeros((max_len, d_model), dtype=jnp.float32)
    pe = pe.at[:, 0::2].set(jnp.sin(ang)[:, : (d_model + 1) // 2])
    pe = pe.at[:, 1::2].set(jnp.cos(ang)[:, : d_model // 2])
    # Built once in the target dtype (no per-forward cast of the whole table).
    return pe[:, None, :].astype(dtype)                                       # (L, 1, D)


# ---------------------------------------------------------------------------
# Tiling helpers
# ---------------------------------------------------------------------------
def _vmem_budget_bytes() -> int:
    """Generation-aware per-step VMEM budget (double-buffered working set)."""
    cap = 64 * 1024 * 1024  # conservative fallback: v7x per-TC physical VMEM
    try:
        info = pltpu.get_tpu_info()
        cap = int(getattr(info, "vmem_capacity_bytes", cap))
    except Exception:
        pass
    # Half of physical, capped at 28 MiB so it always fits under the explicit
    # 32 MiB vmem_limit_bytes set on the pallas_call (safe on v5e/v6e/v7x).
    return min(cap // 2, 28 * 1024 * 1024)


def _choose_seq_tile(S: int, row_bytes_x: int, row_bytes_pe: int,
                     budget_bytes: int) -> int:
    """Largest seq tile targeting ~4 MiB x blocks within the VMEM budget."""
    # Double-buffered footprint per seq row: x tile + out tile + pe tile.
    per_row_db = 2 * (2 * row_bytes_x + row_bytes_pe)
    ts_budget = max(budget_bytes // max(per_row_db, 1), 1)
    # ~4 MiB x blocks amortize the ~0.35 us/step overhead while keeping many
    # grid steps (pipeline depth on 1-TC chips, load balance on v7x's 2 TCs).
    ts_target = max((4 * 1024 * 1024) // max(row_bytes_x, 1), 1)
    ts = min(ts_budget, ts_target, S)
    ts = (ts // 8) * 8                     # sublane alignment
    if ts < 8:
        ts = min(8, S)                     # tiny-S fallback (full-array block)
    return min(ts, S)


# ---------------------------------------------------------------------------
# Wrapper
# ---------------------------------------------------------------------------
def positional_encoding(x: jax.Array, pe: jax.Array, *, donate_x: bool = False) -> jax.Array:
    """x: (S, B, D); pe: (max_len, 1, D) or (max_len, D). Returns x + pe[:S]."""
    S, B, D = x.shape
    assert pe.shape[0] >= S and pe.shape[-1] == D
    pe = pe.reshape(pe.shape[0], 1, D)

    if pe.dtype != x.dtype:
        # Prefer building the table in the target dtype (make_pe_table(dtype=...)).
        pe = pe.astype(x.dtype)

    itemsize = jnp.dtype(x.dtype).itemsize
    budget = _vmem_budget_bytes()
    cost = pl.CostEstimate(
        flops=S * B * D,
        transcendentals=0,
        bytes_accessed=(2 * S * B * D + S * D) * itemsize,
    )
    compiler_params = pltpu.CompilerParams(
        dimension_semantics=("parallel",),        # shards seq tiles across TCs (v7x)
        vmem_limit_bytes=32 * 1024 * 1024,
    )
    io_aliases = {0: 0} if donate_x else {}

    use_3d = (D % 128 == 0) and (B >= 8)

    if use_3d:
        # No flatten, no in-kernel replication: implicit broadcast in the add.
        ts = _choose_seq_tile(S, B * D * itemsize, D * itemsize, budget)
        grid = (pl.cdiv(S, ts),)
        out = pl.pallas_call(
            _pe_add_3d_kernel,
            out_shape=jax.ShapeDtypeStruct((S, B, D), x.dtype),
            grid_spec=pltpu.PrefetchScalarGridSpec(
                num_scalar_prefetch=0,
                grid=grid,
                in_specs=[
                    pl.BlockSpec((ts, B, D), lambda i: (i, 0, 0)),
                    pl.BlockSpec((ts, 1, D), lambda i: (i, 0, 0)),
                ],
                out_specs=pl.BlockSpec((ts, B, D), lambda i: (i, 0, 0)),
            ),
            compiler_params=compiler_params,
            cost_estimate=cost,
            input_output_aliases=io_aliases,
        )(x, pe)
        return out

    # Flattened lane-dense path (small D and/or small B).
    # NOTE: for real model shapes keep B*D a multiple of 128 for dense vst.
    x2 = x.reshape(S, B * D)                       # metadata reshape, no slice
    pe2 = pe.reshape(pe.shape[0], D)

    ts = _choose_seq_tile(S, B * D * itemsize, D * itemsize, budget)
    if ts % 8 != 0:
        # Tiny-S fallback: pe block must then equal pe2's full first dim.
        pe2 = pe2[:S]
    grid = (pl.cdiv(S, ts),)

    kernel = functools.partial(_pe_add_flat_kernel, batch=B)
    out2 = pl.pallas_call(
        kernel,
        out_shape=jax.ShapeDtypeStruct((S, B * D), x.dtype),
        grid_spec=pltpu.PrefetchScalarGridSpec(
            num_scalar_prefetch=0,
            grid=grid,
            in_specs=[
                pl.BlockSpec((ts, B * D), lambda i: (i, 0)),   # x tile (lane-dense)
                pl.BlockSpec((ts, D), lambda i: (i, 0)),       # pe rows from full buffer
            ],
            out_specs=pl.BlockSpec((ts, B * D), lambda i: (i, 0)),
        ),
        compiler_params=compiler_params,
        cost_estimate=cost,
        input_output_aliases=io_aliases,
    )(x2, pe2)
    return out2.reshape(S, B, D)


# ---------------------------------------------------------------------------
# Demo / correctness check
# ---------------------------------------------------------------------------
if __name__ == "__main__":
    key = jax.random.PRNGKey(0)
    S, B, D = 8, 2, 32                      # seq=8, batch=2, d_model=32
    max_len = 64                            # small synthetic max_len (>= S)

    x = jax.random.normal(key, (S, B, D), dtype=jnp.float32)
    pe = make_pe_table(D, max_len, dtype=x.dtype)   # built once in target dtype

    # Reference computed before the (donating) kernel call.
    ref = x + pe[:S]

    out = positional_encoding(x, pe, donate_x=True)
    out = jax.block_until_ready(out)

    assert out.shape == (S, B, D)
    assert jnp.allclose(out, ref, atol=1e-6), "mismatch vs reference"
    print("KERNEL_OK")
</pallas_src>

<mosaic_0001>
module attributes {stable_mosaic.version = 11 : i64} {
  func.func @_pe_add_flat_kernel(%arg0: i32, %arg1: memref<8x64xf32, #tpu.memory_space<vmem>>, %arg2: memref<8x32xf32, #tpu.memory_space<vmem>>, %arg3: memref<8x64xf32, #tpu.memory_space<vmem>>) attributes {dimension_semantics = [#tpu.dimension_semantics<parallel>], iteration_bounds = array<i64: 1>, scalar_prefetch = 0 : i64, scratch_operands = 0 : i64, tpu.core_type = #tpu.core_type<tc>, window_params = [{transform_indices = @transform_0, window_bounds = array<i64: 8, 64>}, {transform_indices = @transform_1, window_bounds = array<i64: 8, 32>}, {transform_indices = @transform_2, window_bounds = array<i64: 8, 64>}]} {
    %c0 = arith.constant 0 : index
    %c0_0 = arith.constant 0 : index
    %0 = vector.load %arg2[%c0, %c0_0] : memref<8x32xf32, #tpu.memory_space<vmem>>, vector<8x32xf32>
    %1 = tpu.concatenate %0, %0 in 1 : vector<8x32xf32>, vector<8x32xf32> -> vector<8x64xf32>
    %c0_1 = arith.constant 0 : index
    %c0_2 = arith.constant 0 : index
    %2 = vector.load %arg1[%c0_1, %c0_2] : memref<8x64xf32, #tpu.memory_space<vmem>>, vector<8x64xf32>
    %3 = arith.addf %2, %1 : vector<8x64xf32>
    %c0_3 = arith.constant 0 : index
    %c0_4 = arith.constant 0 : index
    %4 = vector.load %arg3[%c0_3, %c0_4] : memref<8x64xf32, #tpu.memory_space<vmem>>, vector<8x64xf32>
    tpu.vector_store %arg3[%c0_3, %c0_4], %3 {strides = array<i32>} : memref<8x64xf32, #tpu.memory_space<vmem>>, vector<8x64xf32>,
    return
  }
  func.func @transform_0(%arg0: i32) -> (i32, i32) {
    %c0_i32 = arith.constant 0 : i32
    %c0_i32_0 = arith.constant 0 : i32
    return %arg0, %c0_i32 : i32, i32
  }
  func.func @transform_1(%arg0: i32) -> (i32, i32) {
    %c0_i32 = arith.constant 0 : i32
    %c0_i32_0 = arith.constant 0 : i32
    return %arg0, %c0_i32 : i32, i32
  }
  func.func @transform_2(%arg0: i32) -> (i32, i32) {
    %c0_i32 = arith.constant 0 : i32
    %c0_i32_0 = arith.constant 0 : i32
    return %arg0, %c0_i32 : i32, i32
  }
}

</mosaic_0001>

<bundles_post_ra>
// kernel: tpu_custom_call.1
= control target key start
LH: loop header
LB: loop body
LE: loop exit
PB: predicated region body
PF: predicated region fallthrough
CT: control target
= control target key end

     0   :  { %7 = vsyncpa [#allocation3], 0  ;;  %s146_s0 = inlined_call_operand.hbm [shape: f32[8,64], index: 0, kind: input, shape index: {}, may-alias: {0,2}]   ;;  %s147_s1 = inlined_call_operand.vmem [shape: f32[64,32], index: 1, kind: input, shape index: {}]   ;;  %s148_s2 = inlined_call_operand.hbm [shape: f32[8,64], index: 2, kind: output, shape index: {}, may-alias: {0,2}]  }
   0x1   :  { %8 = vsyncpa [#allocation4], 0  ;;  %s101_s9 = smov [#allocation2]   ;;  %s53_s13 = scalar_lea.hbm %s146_s0, 128 }
   0x2   :  { %s15_s10 = sshll.u32 %s101_s9, 4  ;;  %p54_p0 = scmp.ne.s32.totalorder %s146_s0, %s53_s13  ;;  %s16_s10 = int_to_ptr.vmem [resolvable:$true] %s15_s10 }
   0x3   :  { %p57_p1 = scmp.lt.u32.totalorder %s53_s13, %s146_s0 }
   0x5   :  { %p59_p2 = pnand %p57_p1, %p54_p0 }
   0x7   :  { %62 = shalt.err (!%p59_p2)
}
   0x8   :  { %s63_s18 = scalar_lea.vmem %s16_s10, 128  ;;  %p68_p4 = scmp.lt.s32.totalorder %s16_s10, %s16_s10 }
   0x9   :  { %p64_p3 = scmp.ne.s32.totalorder %s16_s10, %s63_s18  ;;  %p69_p5 = scmp.lt.s32.totalorder %s63_s18, %s63_s18 }
   0xb   :  { %p70_p6 = por %p69_p5, %p68_p4 }
   0xd   :  { %p71_p7 = pnand %p70_p6, %p64_p3 }
   0xf   :  { %74 = shalt.err (!%p71_p7)
}
  0x10   :  { %18 = dma.hbm_to_vmem [thread:$0]  %s146_s0, 128, %s16_s10, [#allocation3]  }
  0x11   :  { %97 = dma.done.wait [#allocation3], 128  }
  0x12   :  { %98 = vsyncadd [#allocation3], 4294967168  ;;  %v24_v0 = vld [vmem:[%s147_s1] sm:$0xff]  ;;  %s102_s23 = smov 32   ;;  %vm29_vm0 = vcmask 261120   ;;  %s103_s24 = smov [#allocation5]  }
  0x13   :  { %26 = vrot.lane.b32.xlu0 %v24_v0, %s102_s23  ;;  %v31_v1 = vld [vmem:[#allocation2] sm:$0xff]  ;;  %s41_s25 = sshll.u32 %s103_s24, 4  ;;  %vm33_vm1 = vcmask 523264   ;;  %s42_s25 = int_to_ptr.vmem [resolvable:$true] %s41_s25 }
  0x14   :  { %s75_s26 = scalar_lea.vmem %s42_s25, 128  ;;  %p80_p9 = scmp.lt.s32.totalorder %s42_s25, %s42_s25 }
  0x15   :  { %p76_p8 = scmp.ne.s32.totalorder %s42_s25, %s75_s26  ;;  %p81_p10 = scmp.lt.s32.totalorder %s75_s26, %s75_s26 }
  0x17   :  { %p82_p11 = por %p81_p10, %p80_p9 }
  0x19   :  { %p83_p12 = pnand %p82_p11, %p76_p8 }
  0x85   :  { %v27_v2 = vpop.permute.xlu0 %26 }
  0x86   :  { %v30_v3 = vsel %vm29_vm0, %v24_v0, %v27_v2 }
  0x87   :  { %v32_v4 = vadd.f32 %v31_v1, %v30_v3 }
  0x89   :  { %34 = vst.msk [vmem:[#allocation5] sm:$0xff] %vm33_vm1, %v32_v4 }
  0x8a   :  { %86 = shalt.err (!%p83_p12)
}
  0x8b   :  { %s87_s27 = scalar_lea.hbm %s148_s2, 128 }
  0x8c   :  { %p88_p13 = scmp.ne.s32.totalorder %s148_s2, %s87_s27  ;;  %p91_p0 = scmp.lt.u32.totalorder %s87_s27, %s148_s2 }
  0x8e   :  { %p93_p1 = pnand %p91_p0, %p88_p13 }
  0x90   :  { %96 = shalt.err (!%p93_p1)
}
  0x91   :  { %44 = dma.vmem_to_hbm [thread:$0]  %s42_s25, 128, %s148_s2, [#allocation4]  }
  0x92   :  { %99 = dma.done.wait [#allocation4], 128  }
  0x93   :  { %100 = vsyncadd [#allocation4], 4294967168 }
  0x94   :  { %48 = vsyncpa [#allocation3], 1 }
  0x95   :  { %49 = vsyncpa [#allocation4], 1 }

</bundles_post_ra>
